<compile_context>
chip_gen: v6e
topology: v6e:2x2x1
jax: 0.10.0
libtpu: 0.0.40
codegen_flags: <defaults>
</compile_context>

<pallas_src>
import functools

import jax
import jax.numpy as jnp
from jax import lax
from jax.experimental import pallas as pl
from jax.experimental.pallas import tpu as pltpu
import numpy as np


def fam_kernel(x1_ref, x2_ref, m_ref, w_ref, o_ref, *, W):
    """Whole-problem kernel (no grid).

    x1_ref, x2_ref, o_ref : (BC, HW)      f32, spatial dims flattened on lanes
    m_ref                 : (8, BC, HW)   f32 0/1 boundary masks (non-center taps)
    w_ref                 : (BC, 10*BC)   bf16 packed weights:
                              cols [0 : 9*BC)      batch-block-diag conv taps
                              cols [9*BC : 10*BC)  diag(bias)  (ones-block rows)
    """
    BC, HW = x1_ref.shape

    x1 = x1_ref[...].astype(jnp.float32)
    x = x1 * x2_ref[...].astype(jnp.float32)        # elementwise hot path (VPU)

    # 9 shifted + boundary-masked taps (XLU lane rolls + one VPU mul each).
    taps = []
    mi = 0
    for dy in (-1, 0, 1):
        for dx in (-1, 0, 1):
            off = dy * W + dx                        # source pixel = dest + off
            if off == 0:
                taps.append(x)
            else:
                rolled = pltpu.roll(x, shift=(-off) % HW, axis=1)
                taps.append(rolled * m_ref[mi])      # wrap/OOB positions -> 0
                mi += 1

    # Constant ones block: together with the trailing diag(bias) weight
    # columns this folds the bias add into the MXU contraction.
    taps.append(jnp.ones((BC, HW), jnp.float32))

    # (10*BC, HW) bf16 im2col -> single MXU push with f32 accumulation.
    im2col = jnp.concatenate(taps, axis=0).astype(jnp.bfloat16)
    conv = jnp.dot(w_ref[...], im2col, preferred_element_type=jnp.float32)

    # Residual kept in f32 (single VPU add epilogue).
    o_ref[...] = (x1 + conv).astype(o_ref.dtype)


def fam_pack(weight, bias, B, H, W):
    """One-time packing of conv params + boundary masks (call once, not per step).

    weight: (C, C, 3, 3) OIHW (PyTorch), bias: (C,).
    Returns (w_packed bf16 (BC, 10*BC), masks f32 (8, BC, HW)).
    """
    C = weight.shape[0]
    BC, HW = B * C, H * W

    # (co, ci, kh, kw) -> (k = kh*3+kw, co, ci), block-diagonal over batch so
    # one (BC, 9*BC) @ (9*BC, HW) contraction does the conv for every b.
    w_taps = jnp.transpose(weight, (2, 3, 0, 1)).reshape(9, C, C)
    eye_b = jnp.eye(B, dtype=weight.dtype)
    w_blocks = jax.vmap(lambda wk: jnp.kron(eye_b, wk))(w_taps)        # (9, BC, BC)
    w_conv = jnp.transpose(w_blocks, (1, 0, 2)).reshape(BC, 9 * BC)    # (BC, 9*BC)

    # Bias folded as trailing diag block (pairs with the in-kernel ones rows).
    w_bias = jnp.diag(jnp.tile(bias, B))                               # (BC, BC)
    w_packed = jnp.concatenate([w_conv, w_bias], axis=1).astype(jnp.bfloat16)

    # 8 non-center boundary masks, pre-broadcast over the BC sublanes so the
    # kernel does tile-aligned multiplies with no iota / div / mod / select.
    h_idx = jnp.arange(HW, dtype=jnp.int32) // W
    w_idx = jnp.arange(HW, dtype=jnp.int32) % W
    rows = []
    for dy in (-1, 0, 1):
        for dx in (-1, 0, 1):
            if dy == 0 and dx == 0:
                continue
            m = jnp.ones((HW,), jnp.bool_)
            if dy == -1:
                m = m & (h_idx >= 1)
            if dy == 1:
                m = m & (h_idx <= H - 2)
            if dx == -1:
                m = m & (w_idx >= 1)
            if dx == 1:
                m = m & (w_idx <= W - 2)
            rows.append(m)
    masks = jnp.stack(rows).astype(jnp.float32)                        # (8, HW)
    masks = jnp.broadcast_to(masks[:, None, :], (8, BC, HW))
    return w_packed, jnp.asarray(masks)


@jax.jit
def fam_forward(x1, x2, w_packed, masks):
    """x1, x2: (B, C, H, W) NCHW; w_packed/masks from fam_pack()."""
    B, C, H, W = x1.shape
    BC, HW = B * C, H * W

    # Lane-dense 2D views (pure layout plumbing, outside the kernel).
    x1f = x1.reshape(BC, HW)
    x2f = x2.reshape(BC, HW)

    kernel = functools.partial(fam_kernel, W=W)
    vmem = pltpu.MemorySpace.VMEM
    out_flat = pl.pallas_call(
        kernel,
        out_shape=jax.ShapeDtypeStruct((BC, HW), x1.dtype),
        in_specs=[
            pl.BlockSpec(memory_space=vmem),   # x1
            pl.BlockSpec(memory_space=vmem),   # x2
            pl.BlockSpec(memory_space=vmem),   # boundary masks
            pl.BlockSpec(memory_space=vmem),   # packed im2col weight (+bias)
        ],
        out_specs=pl.BlockSpec(memory_space=vmem),
    )(x1f, x2f, masks, w_packed)

    return out_flat.reshape(B, C, H, W)


if __name__ == "__main__":
    B, C, H, W = 2, 4, 16, 16   # FAM(channel=4) on (2, 4, 16, 16) NCHW inputs

    key = jax.random.PRNGKey(0)
    k1, k2, kw, kb = jax.random.split(key, 4)

    x1 = jax.random.normal(k1, (B, C, H, W), dtype=jnp.float32)
    x2 = jax.random.normal(k2, (B, C, H, W), dtype=jnp.float32)

    # Deterministic Conv2d(channel, channel, 3) params, PyTorch fan-in uniform.
    fan_in = C * 3 * 3
    bound = 1.0 / np.sqrt(fan_in)
    weight = jax.random.uniform(kw, (C, C, 3, 3), jnp.float32, -bound, bound)
    bias = jax.random.uniform(kb, (C,), jnp.float32, -bound, bound)

    # Pack weights/masks ONCE (next to the model params), reuse every call.
    w_packed, masks = fam_pack(weight, bias, B, H, W)
    w_packed = jax.block_until_ready(w_packed)

    out = fam_forward(x1, x2, w_packed, masks)
    out = jax.block_until_ready(out)

    # Plain-JAX f32 reference (cross-correlation, SAME padding == PyTorch pad=1).
    conv_ref = lax.conv_general_dilated(
        x1 * x2, weight, window_strides=(1, 1), padding="SAME",
        dimension_numbers=("NCHW", "OIHW", "NCHW"))
    ref = x1 + conv_ref + bias[None, :, None, None]

    # bf16 MXU operands -> loosened tolerance (review item 3).
    if not np.allclose(np.asarray(out), np.asarray(ref), atol=2e-2, rtol=2e-2):
        err = np.max(np.abs(np.asarray(out) - np.asarray(ref)))
        raise AssertionError(f"Pallas FAM kernel does not match reference, max err={err}")

    print("KERNEL_OK")
</pallas_src>

<mosaic_0001>
module attributes {stable_mosaic.version = 11 : i64} {
  func.func @fam_kernel(%arg0: memref<8x256xf32, #tpu.memory_space<vmem>>, %arg1: memref<8x256xf32, #tpu.memory_space<vmem>>, %arg2: memref<8x8x256xf32, #tpu.memory_space<vmem>>, %arg3: memref<8x80xbf16, #tpu.memory_space<vmem>>, %arg4: memref<8x256xf32, #tpu.memory_space<vmem>>) attributes {dimension_semantics = [], scalar_prefetch = 0 : i64, scratch_operands = 0 : i64, tpu.core_type = #tpu.core_type<tc>} {
    %c0 = arith.constant 0 : index
    %c0_0 = arith.constant 0 : index
    %0 = vector.load %arg0[%c0, %c0_0] : memref<8x256xf32, #tpu.memory_space<vmem>>, vector<8x256xf32>
    %c0_1 = arith.constant 0 : index
    %c0_2 = arith.constant 0 : index
    %1 = vector.load %arg1[%c0_1, %c0_2] : memref<8x256xf32, #tpu.memory_space<vmem>>, vector<8x256xf32>
    %2 = arith.mulf %0, %1 : vector<8x256xf32>
    %c17_i32 = arith.constant 17 : i32
    %3 = tpu.dynamic_rotate %2 by %c17_i32 dim 1 : vector<8x256xf32>, i32 -> vector<8x256xf32>
    %c0_3 = arith.constant 0 : index
    %c0_4 = arith.constant 0 : index
    %c0_5 = arith.constant 0 : index
    %4 = vector.load %arg2[%c0_3, %c0_4, %c0_5] : memref<8x8x256xf32, #tpu.memory_space<vmem>>, vector<1x8x256xf32>
    %5 = vector.shape_cast %4 : vector<1x8x256xf32> to vector<8x256xf32>
    %6 = arith.mulf %3, %5 : vector<8x256xf32>
    %c16_i32 = arith.constant 16 : i32
    %7 = tpu.dynamic_rotate %2 by %c16_i32 dim 1 : vector<8x256xf32>, i32 -> vector<8x256xf32>
    %c1 = arith.constant 1 : index
    %c0_6 = arith.constant 0 : index
    %c0_7 = arith.constant 0 : index
    %8 = vector.load %arg2[%c1, %c0_6, %c0_7] : memref<8x8x256xf32, #tpu.memory_space<vmem>>, vector<1x8x256xf32>
    %9 = vector.shape_cast %8 : vector<1x8x256xf32> to vector<8x256xf32>
    %10 = arith.mulf %7, %9 : vector<8x256xf32>
    %c15_i32 = arith.constant 15 : i32
    %11 = tpu.dynamic_rotate %2 by %c15_i32 dim 1 : vector<8x256xf32>, i32 -> vector<8x256xf32>
    %c2 = arith.constant 2 : index
    %c0_8 = arith.constant 0 : index
    %c0_9 = arith.constant 0 : index
    %12 = vector.load %arg2[%c2, %c0_8, %c0_9] : memref<8x8x256xf32, #tpu.memory_space<vmem>>, vector<1x8x256xf32>
    %13 = vector.shape_cast %12 : vector<1x8x256xf32> to vector<8x256xf32>
    %14 = arith.mulf %11, %13 : vector<8x256xf32>
    %c1_i32 = arith.constant 1 : i32
    %15 = tpu.dynamic_rotate %2 by %c1_i32 dim 1 : vector<8x256xf32>, i32 -> vector<8x256xf32>
    %c3 = arith.constant 3 : index
    %c0_10 = arith.constant 0 : index
    %c0_11 = arith.constant 0 : index
    %16 = vector.load %arg2[%c3, %c0_10, %c0_11] : memref<8x8x256xf32, #tpu.memory_space<vmem>>, vector<1x8x256xf32>
    %17 = vector.shape_cast %16 : vector<1x8x256xf32> to vector<8x256xf32>
    %18 = arith.mulf %15, %17 : vector<8x256xf32>
    %c255_i32 = arith.constant 255 : i32
    %19 = tpu.dynamic_rotate %2 by %c255_i32 dim 1 : vector<8x256xf32>, i32 -> vector<8x256xf32>
    %c4 = arith.constant 4 : index
    %c0_12 = arith.constant 0 : index
    %c0_13 = arith.constant 0 : index
    %20 = vector.load %arg2[%c4, %c0_12, %c0_13] : memref<8x8x256xf32, #tpu.memory_space<vmem>>, vector<1x8x256xf32>
    %21 = vector.shape_cast %20 : vector<1x8x256xf32> to vector<8x256xf32>
    %22 = arith.mulf %19, %21 : vector<8x256xf32>
    %c241_i32 = arith.constant 241 : i32
    %23 = tpu.dynamic_rotate %2 by %c241_i32 dim 1 : vector<8x256xf32>, i32 -> vector<8x256xf32>
    %c5 = arith.constant 5 : index
    %c0_14 = arith.constant 0 : index
    %c0_15 = arith.constant 0 : index
    %24 = vector.load %arg2[%c5, %c0_14, %c0_15] : memref<8x8x256xf32, #tpu.memory_space<vmem>>, vector<1x8x256xf32>
    %25 = vector.shape_cast %24 : vector<1x8x256xf32> to vector<8x256xf32>
    %26 = arith.mulf %23, %25 : vector<8x256xf32>
    %c240_i32 = arith.constant 240 : i32
    %27 = tpu.dynamic_rotate %2 by %c240_i32 dim 1 : vector<8x256xf32>, i32 -> vector<8x256xf32>
    %c6 = arith.constant 6 : index
    %c0_16 = arith.constant 0 : index
    %c0_17 = arith.constant 0 : index
    %28 = vector.load %arg2[%c6, %c0_16, %c0_17] : memref<8x8x256xf32, #tpu.memory_space<vmem>>, vector<1x8x256xf32>
    %29 = vector.shape_cast %28 : vector<1x8x256xf32> to vector<8x256xf32>
    %30 = arith.mulf %27, %29 : vector<8x256xf32>
    %c239_i32 = arith.constant 239 : i32
    %31 = tpu.dynamic_rotate %2 by %c239_i32 dim 1 : vector<8x256xf32>, i32 -> vector<8x256xf32>
    %c7 = arith.constant 7 : index
    %c0_18 = arith.constant 0 : index
    %c0_19 = arith.constant 0 : index
    %32 = vector.load %arg2[%c7, %c0_18, %c0_19] : memref<8x8x256xf32, #tpu.memory_space<vmem>>, vector<1x8x256xf32>
    %33 = vector.shape_cast %32 : vector<1x8x256xf32> to vector<8x256xf32>
    %34 = arith.mulf %31, %33 : vector<8x256xf32>
    %cst = arith.constant 1.000000e+00 : f32
    %35 = vector.broadcast %cst : f32 to vector<8x256xf32>
    %36 = tpu.concatenate %6, %10, %14, %18, %2, %22, %26, %30, %34, %35 in 0 : vector<8x256xf32>, vector<8x256xf32>, vector<8x256xf32>, vector<8x256xf32>, vector<8x256xf32>, vector<8x256xf32>, vector<8x256xf32>, vector<8x256xf32>, vector<8x256xf32>, vector<8x256xf32> -> vector<80x256xf32>
    %37 = arith.truncf %36 : vector<80x256xf32> to vector<80x256xbf16>
    %c0_20 = arith.constant 0 : index
    %c0_21 = arith.constant 0 : index
    %38 = vector.load %arg3[%c0_20, %c0_21] : memref<8x80xbf16, #tpu.memory_space<vmem>>, vector<8x80xbf16>
    %cst_22 = arith.constant dense<0.000000e+00> : vector<8x256xf32>
    %39 = tpu.matmul %38, %37, %cst_22 {dimension_numbers = #tpu.dot_dimension_numbers<[1], [0], [0], [1], [0, 0, 1, 1], [], []>} : vector<8x80xbf16>, vector<80x256xbf16>, vector<8x256xf32> -> vector<8x256xf32>
    %40 = arith.addf %0, %39 : vector<8x256xf32>
    %c0_23 = arith.constant 0 : index
    %c0_24 = arith.constant 0 : index
    %41 = vector.load %arg4[%c0_23, %c0_24] : memref<8x256xf32, #tpu.memory_space<vmem>>, vector<8x256xf32>
    tpu.vector_store %arg4[%c0_23, %c0_24], %40 {strides = array<i32>} : memref<8x256xf32, #tpu.memory_space<vmem>>, vector<8x256xf32>,
    return
  }
}

</mosaic_0001>

<bundles_post_ra>
// kernel: fam_forward.1
= control target key start
LH: loop header
LB: loop body
LE: loop exit
PB: predicated region body
PF: predicated region fallthrough
CT: control target
= control target key end

     0   :  { %s210_s23 = smov 113   ;;  %s211_s24 = smov 111   ;;  %v216_v6 = vmov 0   ;;  %v28_v7 = vlaneseq  ;;  %v219_v27 = vmov 1.0   ;;  %vm132_vm8 = vcmask 654336   ;;  %s354_s0 = inlined_call_operand.vmem [shape: f32[8,256], index: 0, kind: input, shape index: {}]   ;;  %s355_s1 = inlined_call_operand.vmem [shape: f32[8,256], index: 1, kind: input, shape index: {}]   ;;  %s356_s2 = inlined_call_operand.vmem [shape: f32[8,8,256], index: 2, kind: input, shape index: {}]   ;;  %s357_s3 = inlined_call_operand.vmem [shape: bf16[8,80], index: 3, kind: input, shape index: {}]   ;;  %s358_s4 = inlined_call_operand.vmem [shape: f32[8,256], index: 4, kind: output, shape index: {}]  }
   0x1   :  { %v248_v0 = vld [vmem:[%s354_s0] sm:$0xff]  ;;  %v256_v2 = vld [vmem:[%s354_s0 + $0x8] sm:$0xff]  ;;  %s212_s0 = smov 112   ;;  %s213_s25 = smov 127   ;;  %168 = vmatprep.mubr.bf16.mxu0 %v216_v6  ;;  %v197_v11 = vld [vmem:[%s356_s2 + $0x70] sm:$0xff] }
   0x2   :  { %v20_v1 = vld [vmem:[%s355_s1] sm:$0xff]  ;;  %v21_v4 = vld [vmem:[%s355_s1 + $0x8] sm:$0xff]  ;;  %s214_s1 = smov 15   ;;  %s215_s26 = smov 1   ;;  %v283_v8 = vand.u32 127, %v28_v7  ;;  %v198_v12 = vld [vmem:[%s356_s2 + $0x78] sm:$0xff] }
   0x3   :  { %v259_v3 = vmul.f32 %v20_v1, %v248_v0  ;;  %v267_v5 = vmul.f32 %v21_v4, %v256_v2  ;;  %s217_s27 = smov 17   ;;  %s218_s28 = smov 16   ;;  %v193_v17 = vld [vmem:[%s356_s2 + $0x50] sm:$0xff]  ;;  %v194_v20 = vld [vmem:[%s356_s2 + $0x58] sm:$0xff]  ;;  %v195_v23 = vld [vmem:[%s356_s2 + $0x60] sm:$0xff] }
   0x4   :  { %vm113_vm0 = vcmp.lt.s32.totalorder %v283_v8, 111  ;;  %vm89_vm1 = vcmp.lt.s32.totalorder %v283_v8, 113  ;;  %vm101_vm2 = vcmp.lt.s32.totalorder %v283_v8, 112  ;;  %v196_v24 = vld [vmem:[%s356_s2 + $0x68] sm:$0xff]  ;;  %vm77_vm3 = vcmp.lt.s32.totalorder %v283_v8, 127  ;;  %v191_v36 = vld [vmem:[%s356_s2 + $0x40] sm:$0xff] }
   0x5   :  { %85 = vrot.lane.b32.xlu1 %v259_v3, %s210_s23  ;;  %109 = vrot.lane.b32.xlu0 %v259_v3, %s211_s24  ;;  %v192_v37 = vld [vmem:[%s356_s2 + $0x48] sm:$0xff]  ;;  %vm53_vm4 = vcmp.lt.s32.totalorder %v283_v8, 15  ;;  %v187_v50 = vld [vmem:[%s356_s2 + $0x20] sm:$0xff]  ;;  %vm65_vm5 = vcmp.lt.s32.totalorder %v283_v8, 1  ;;  %vm30_vm6 = vcmp.lt.s32.totalorder %v283_v8, 17  ;;  %vm41_vm7 = vcmp.lt.s32.totalorder %v283_v8, 16 }
   0x6   :  { %v188_v51 = vld [vmem:[%s356_s2 + $0x28] sm:$0xff]  ;;  %v189_v54 = vld [vmem:[%s356_s2 + $0x30] sm:$0xff]  ;;  %v190_v55 = vld [vmem:[%s356_s2 + $0x38] sm:$0xff] }
   0x7   :  { %v33_v6 = vld [vmem:[%s356_s2] sm:$0xff]  ;;  %v34_v7 = vld [vmem:[%s356_s2 + $0x8] sm:$0xff] }
   0x9   :  { %87 = vrot.lane.b32.xlu1 %v267_v5, %s210_s23  ;;  %111 = vrot.lane.b32.xlu0 %v267_v5, %s211_s24 }
   0xd   :  { %99 = vrot.lane.b32.xlu1 %v267_v5, %s212_s0  ;;  %97 = vrot.lane.b32.xlu0 %v259_v3, %s212_s0 }
  0x11   :  { %75 = vrot.lane.b32.xlu1 %v267_v5, %s213_s25  ;;  %73 = vrot.lane.b32.xlu0 %v259_v3, %s213_s25 }
  0x15   :  { %51 = vrot.lane.b32.xlu1 %v267_v5, %s214_s1  ;;  %49 = vrot.lane.b32.xlu0 %v259_v3, %s214_s1 }
  0x19   :  { %63 = vrot.lane.b32.xlu1 %v267_v5, %s215_s26  ;;  %61 = vrot.lane.b32.xlu0 %v259_v3, %s215_s26 }
  0x1d   :  { %26 = vrot.lane.b32.xlu1 %v267_v5, %s217_s27  ;;  %24 = vrot.lane.b32.xlu0 %v259_v3, %s217_s27 }
  0x21   :  { %39 = vrot.lane.b32.xlu1 %v267_v5, %s218_s28  ;;  %37 = vrot.lane.b32.xlu0 %v259_v3, %s218_s28 }
  0x77   :  { %v86_v9 = vpop.permute.xlu1 %85  ;;  %v110_v10 = vpop.permute.xlu0 %109 }
  0x7b   :  { %v88_v13 = vpop.permute.xlu1 %87  ;;  %v112_v14 = vpop.permute.xlu0 %111 }
  0x7c   :  { %v114_v15 = vsel %vm113_vm0, %v110_v10, %v112_v14  ;;  %v115_v16 = vsel %vm113_vm0, %v112_v14, %v110_v10  ;;  %v90_v21 = vsel %vm89_vm1, %v86_v9, %v88_v13  ;;  %v91_v22 = vsel %vm89_vm1, %v88_v13, %v86_v9 }
  0x7d   :  { %v119_v18 = vmul.f32 %v197_v11, %v114_v15  ;;  %v120_v19 = vmul.f32 %v198_v12, %v115_v16  ;;  %v95_v32 = vmul.f32 %v193_v17, %v90_v21  ;;  %v96_v33 = vmul.f32 %v194_v20, %v91_v22  ;;  %v185_v11 = vld [vmem:[%s356_s2 + $0x10] sm:$0xff]  ;;  %v186_v12 = vld [vmem:[%s356_s2 + $0x18] sm:$0xff]  ;;  %v131_v22 = vld [vmem:[%s357_s3] sm:$0xf] }
  0x7f   :  { %v100_v25 = vpop.permute.xlu1 %99  ;;  %v98_v26 = vpop.permute.xlu0 %97  ;;  %v130_v28 = vpack.c.bf16 %v219_v27, %v120_v19  ;;  %v129_v29 = vpack.c.bf16 %v219_v27, %v119_v18 }
  0x80   :  { %v102_v30 = vsel %vm101_vm2, %v98_v26, %v100_v25  ;;  %v103_v31 = vsel %vm101_vm2, %v100_v25, %v98_v26 }
  0x81   :  { %v107_v34 = vmul.f32 %v195_v23, %v102_v30  ;;  %v108_v35 = vmul.f32 %v196_v24, %v103_v31  ;;  %142 = vmatprep.subr.bf16.mxu0 %v130_v28 }
  0x82   :  { %143 = vmatpush1.bf16.msra.mxu0 %v129_v29 }
  0x83   :  { %v76_v38 = vpop.permute.xlu1 %75  ;;  %v74_v39 = vpop.permute.xlu0 %73  ;;  %v128_v40 = vpack.c.bf16 %v108_v35, %v96_v33  ;;  %v127_v41 = vpack.c.bf16 %v107_v34, %v95_v32 }
  0x84   :  { %v78_v42 = vsel %vm77_vm3, %v74_v39, %v76_v38  ;;  %v79_v43 = vsel %vm77_vm3, %v76_v38, %v74_v39 }
  0x85   :  { %v83_v44 = vmul.f32 %v191_v36, %v78_v42  ;;  %v84_v45 = vmul.f32 %v192_v37, %v79_v43  ;;  %144 = vmatprep.subr.bf16.mxu0 %v128_v40 }
  0x86   :  { %145 = vmatpush1.bf16.msra.mxu0 %v127_v41 }
  0x87   :  { %v52_v46 = vpop.permute.xlu1 %51  ;;  %v50_v47 = vpop.permute.xlu0 %49  ;;  %v126_v48 = vpack.c.bf16 %v84_v45, %v267_v5  ;;  %v125_v49 = vpack.c.bf16 %v83_v44, %v259_v3 }
  0x88   :  { %v54_v52 = vsel %vm53_vm4, %v50_v47, %v52_v46  ;;  %v55_v53 = vsel %vm53_vm4, %v52_v46, %v50_v47 }
  0x89   :  { %146 = vmatprep.subr.bf16.mxu0 %v126_v48  ;;  %v59_v60 = vmul.f32 %v187_v50, %v55_v53  ;;  %v60_v61 = vmul.f32 %v188_v51, %v54_v52 }
  0x8a   :  { %147 = vmatpush1.bf16.msra.mxu0 %v125_v49 }
  0x8b   :  { %v64_v56 = vpop.permute.xlu1 %63  ;;  %v62_v57 = vpop.permute.xlu0 %61 }
  0x8c   :  { %v66_v58 = vsel %vm65_vm5, %v62_v57, %v64_v56  ;;  %v67_v59 = vsel %vm65_vm5, %v64_v56, %v62_v57 }
  0x8d   :  { %v71_v62 = vmul.f32 %v189_v54, %v67_v59  ;;  %v72_v63 = vmul.f32 %v190_v55, %v66_v58 }
  0x8f   :  { %v27_v1 = vpop.permute.xlu1 %26  ;;  %v25_v3 = vpop.permute.xlu0 %24  ;;  %v124_v4 = vpack.c.bf16 %v72_v63, %v60_v61  ;;  %v123_v5 = vpack.c.bf16 %v71_v62, %v59_v60 }
  0x90   :  { %v31_v9 = vsel %vm30_vm6, %v25_v3, %v27_v1  ;;  %v32_v10 = vsel %vm30_vm6, %v27_v1, %v25_v3 }
  0x91   :  { %148 = vmatprep.subr.bf16.mxu0 %v124_v4  ;;  %v35_v8 = vmul.f32 %v33_v6, %v32_v10  ;;  %v36_v17 = vmul.f32 %v34_v7, %v31_v9 }
  0x92   :  { %149 = vmatpush1.bf16.msra.mxu0 %v123_v5 }
  0x93   :  { %v40_v13 = vpop.permute.xlu1 %39  ;;  %v38_v14 = vpop.permute.xlu0 %37 }
  0x94   :  { %v42_v15 = vsel %vm41_vm7, %v38_v14, %v40_v13  ;;  %v43_v16 = vsel %vm41_vm7, %v40_v13, %v38_v14 }
  0x95   :  { %v47_v18 = vmul.f32 %v185_v11, %v43_v16  ;;  %v48_v19 = vmul.f32 %v186_v12, %v42_v15 }
  0x97   :  { %v122_v20 = vpack.c.bf16 %v48_v19, %v36_v17  ;;  %v121_v21 = vpack.c.bf16 %v47_v18, %v35_v8 }
  0x99   :  { %150 = vmatprep.subr.bf16.mxu0 %v122_v20 }
  0x9a   :  { %151 = vmatpush1.bf16.msra.mxu0 %v121_v21 }
  0x9d   :  { %199 = vmatmul.mubr.msk.bf16.vlgmr.msra.gmra.mxu0 %vm132_vm8, %v131_v22 }
 0x15d   :  { %v170_v23 = vpop.f32.mrf.mxu0 }
 0x15e   :  { %v177_v24 = vadd.f32 %v170_v23, %v248_v0 }
 0x15f   :  { %v172_v25 = vpop.f32.mrf.mxu0 }
 0x160   :  { %179 = vst [vmem:[%s358_s4] sm:$0xff] %v177_v24  ;;  %v178_v26 = vadd.f32 %v172_v25, %v256_v2 }
 0x161   :  { %v174_v27 = vpop.f32.mrf.mxu0 }
 0x162   :  { %180 = vst [vmem:[%s358_s4 + $0x8] sm:$0xff] %v178_v26 }
 0x163   :  { %v175_v28 = vpop.f32.mrf.mxu0 }

</bundles_post_ra>
